<compile_context>
chip_gen: v7x
topology: tpu7x:2x2x1
jax: 0.10.0
libtpu: 0.0.40
codegen_flags: <defaults>
</compile_context>

<pallas_src>
import functools
from math import sqrt

import jax
import jax.numpy as jnp
from jax import lax
from jax.experimental import pallas as pl
from jax.experimental.pallas import tpu as pltpu


def _round_up(x: int, m: int) -> int:
    return ((x + m - 1) // m) * m


def _pick_tm(B: int, target: int = 256) -> int:
    """Batch tile: one tile for small B; otherwise near-even tiles (mult of 8)."""
    if B <= target:
        return _round_up(B, 8)
    n_tiles = pl.cdiv(B, target)
    return _round_up(pl.cdiv(B, n_tiles), 8)


def _linear_kernel(x_ref, w_ref, b_ref, o_ref):
    # x_ref: (tm, F) f32   -- one batch tile, streamed
    # w_ref: (F, Lp) f32   -- whole weight, VMEM-resident across batch tiles
    # b_ref: (1, Lp) f32   -- bias, VMEM-resident
    # o_ref: (tm, Lp) f32
    o_ref[...] = (
        jnp.dot(
            x_ref[...],
            w_ref[...],
            preferred_element_type=jnp.float32,
            precision=lax.Precision.HIGHEST,
        )
        + b_ref[...]
    ).astype(o_ref.dtype)


@jax.jit
def linear_pallas(x, w_p, b_p):
    """y = x @ w_p + b_p.  x:(B,F) f32, w_p:(F,Lp) f32, b_p:(1,Lp) f32 -> (B,Lp)."""
    B, F = x.shape
    Fw, Lp = w_p.shape
    assert F == Fw and b_p.shape == (1, Lp)

    tm = _pick_tm(B)
    Bp = _round_up(B, tm)
    # Pad x along batch ONLY when strictly necessary (B already tile-aligned
    # in the common case -> zero extra HBM passes over x).
    xp = x if Bp == B else jnp.zeros((Bp, F), x.dtype).at[:B].set(x)

    grid = (Bp // tm,)

    # VMEM budget: 2 x-tile bufs + resident W + resident bias + 2 out-tile bufs.
    vmem_bytes = 4 * (2 * tm * F + F * Lp + 8 * Lp + 2 * tm * Lp) + (1 << 20)
    vmem_bytes = int(min(max(vmem_bytes, 16 << 20), 64 << 20))  # v7x-safe cap

    out = pl.pallas_call(
        _linear_kernel,
        out_shape=jax.ShapeDtypeStruct((Bp, Lp), x.dtype),
        grid_spec=pltpu.PrefetchScalarGridSpec(
            num_scalar_prefetch=0,
            grid=grid,
            in_specs=[
                pl.BlockSpec((tm, F), lambda i: (i, 0)),   # x: streams per batch tile
                pl.BlockSpec((F, Lp), lambda i: (0, 0)),   # W: constant block -> resident
                pl.BlockSpec((1, Lp), lambda i: (0, 0)),   # bias: resident
            ],
            out_specs=pl.BlockSpec((tm, Lp), lambda i: (i, 0)),
        ),
        compiler_params=pltpu.CompilerParams(
            dimension_semantics=("parallel",),   # batch tiles shard across TCs (v7x)
            vmem_limit_bytes=vmem_bytes,
        ),
    )(xp, w_p, b_p)

    return out if Bp == B else out[:B]


class LinearEncoderPallas:
    """JAX/Pallas port of cca_zoo LinearEncoder (f32, matches torch.nn.Linear)."""

    def __init__(self, latent_dimensions: int, feature_size: int,
                 variational: bool = False, key=None):
        self.variational = variational
        self.latent_dimensions = latent_dimensions
        self.feature_size = feature_size
        self._Lp = _round_up(latent_dimensions, 128)   # lane-dense padded latent
        if key is None:
            key = jax.random.PRNGKey(0)
        bound = 1.0 / sqrt(feature_size)  # torch.nn.Linear default init range

        def make_linear(k):
            kw, kb = jax.random.split(k)
            # stored transposed: (feature_size, latent_dimensions)
            w = jax.random.uniform(kw, (feature_size, latent_dimensions),
                                   jnp.float32, -bound, bound)
            b = jax.random.uniform(kb, (1, latent_dimensions),
                                   jnp.float32, -bound, bound)
            return w, b

        def pad(w, b):
            # Pad ONCE at init (weights are static) -> no per-call W pass.
            wp = jnp.zeros((feature_size, self._Lp), jnp.float32)
            wp = wp.at[:, :latent_dimensions].set(w)
            bp = jnp.zeros((1, self._Lp), jnp.float32)
            bp = bp.at[:, :latent_dimensions].set(b)
            return wp, bp

        if self.variational:
            k1, k2 = jax.random.split(key)
            self.w_mu, self.b_mu = make_linear(k1)
            self.w_var, self.b_var = make_linear(k2)
            wmu_p, bmu_p = pad(self.w_mu, self.b_mu)
            wvar_p, bvar_p = pad(self.w_var, self.b_var)
            # Fused (F, 2*Lp): one matmul shares the x HBM stream for mu & logvar.
            self.w_p = jnp.concatenate([wmu_p, wvar_p], axis=1)
            self.b_p = jnp.concatenate([bmu_p, bvar_p], axis=1)
        else:
            self.w, self.b = make_linear(key)
            self.w_p, self.b_p = pad(self.w, self.b)

    def __call__(self, x):
        out = linear_pallas(x, self.w_p, self.b_p)
        L, Lp = self.latent_dimensions, self._Lp
        if self.variational:
            return out[:, :L], out[:, Lp:Lp + L]
        return out[:, :L]


if __name__ == "__main__":
    key = jax.random.PRNGKey(0)
    kx, kp1, kp2, kx2 = jax.random.split(key, 4)

    def ref(xx, ww, bb):
        return jnp.dot(xx, ww, precision=lax.Precision.HIGHEST) + bb

    # --- small demo shapes (spec-consistent) ---
    batch, feature_size, latent_dim = 8, 32, 16
    x = jax.random.normal(kx, (batch, feature_size), jnp.float32)

    # non-variational path
    enc = LinearEncoderPallas(latent_dim, feature_size, variational=False, key=kp1)
    y = jax.block_until_ready(enc(x))
    assert y.shape == (batch, latent_dim)
    assert jnp.allclose(y, ref(x, enc.w, enc.b), atol=1e-5, rtol=1e-5)

    # variational path (single fused pallas_call for mu & logvar)
    enc_v = LinearEncoderPallas(latent_dim, feature_size, variational=True, key=kp2)
    mu, logvar = enc_v(x)
    mu = jax.block_until_ready(mu)
    logvar = jax.block_until_ready(logvar)
    assert mu.shape == (batch, latent_dim) and logvar.shape == (batch, latent_dim)
    assert jnp.allclose(mu, ref(x, enc_v.w_mu, enc_v.b_mu), atol=1e-5, rtol=1e-5)
    assert jnp.allclose(logvar, ref(x, enc_v.w_var, enc_v.b_var), atol=1e-5, rtol=1e-5)

    # --- larger check: multi-tile batch grid + awkward (unaligned) B, F, L ---
    B2, F2, L2 = 500, 300, 40
    x2 = jax.random.normal(kx2, (B2, F2), jnp.float32)
    enc2 = LinearEncoderPallas(L2, F2, variational=False, key=kp1)
    y2 = jax.block_until_ready(enc2(x2))
    assert y2.shape == (B2, L2)
    assert jnp.allclose(y2, ref(x2, enc2.w, enc2.b), atol=1e-4, rtol=1e-4)

    print("KERNEL_OK")
</pallas_src>

<mosaic_0001>
module attributes {stable_mosaic.version = 11 : i64} {
  func.func @_linear_kernel(%arg0: i32, %arg1: memref<8x32xf32, #tpu.memory_space<vmem>>, %arg2: memref<32x128xf32, #tpu.memory_space<vmem>>, %arg3: memref<1x128xf32, #tpu.memory_space<vmem>>, %arg4: memref<8x128xf32, #tpu.memory_space<vmem>>) attributes {dimension_semantics = [#tpu.dimension_semantics<parallel>], iteration_bounds = array<i64: 1>, scalar_prefetch = 0 : i64, scratch_operands = 0 : i64, tpu.core_type = #tpu.core_type<tc>, window_params = [{transform_indices = @transform_0, window_bounds = array<i64: 8, 32>}, {pipeline_mode = #tpu.pipeline_mode<synchronous>, transform_indices = @transform_1, window_bounds = array<i64: 32, 128>}, {pipeline_mode = #tpu.pipeline_mode<synchronous>, transform_indices = @transform_2, window_bounds = array<i64: 1, 128>}, {transform_indices = @transform_3, window_bounds = array<i64: 8, 128>}]} {
    %c0 = arith.constant 0 : index
    %c0_0 = arith.constant 0 : index
    %0 = vector.load %arg1[%c0, %c0_0] : memref<8x32xf32, #tpu.memory_space<vmem>>, vector<8x32xf32>
    %c0_1 = arith.constant 0 : index
    %c0_2 = arith.constant 0 : index
    %1 = vector.load %arg2[%c0_1, %c0_2] : memref<32x128xf32, #tpu.memory_space<vmem>>, vector<32x128xf32>
    %cst = arith.constant dense<0.000000e+00> : vector<8x128xf32>
    %2 = tpu.matmul %0, %1, %cst {dimension_numbers = #tpu.dot_dimension_numbers<[1], [0], [0], [1], [0, 0, 1, 1], [], []>, precision = #tpu.contract_precision<fp32>} : vector<8x32xf32>, vector<32x128xf32>, vector<8x128xf32> -> vector<8x128xf32>
    %c0_3 = arith.constant 0 : index
    %c0_4 = arith.constant 0 : index
    %3 = vector.load %arg3[%c0_3, %c0_4] : memref<1x128xf32, #tpu.memory_space<vmem>>, vector<1x128xf32>
    %4 = vector.broadcast %3 : vector<1x128xf32> to vector<8x128xf32>
    %5 = arith.addf %2, %4 : vector<8x128xf32>
    %c0_5 = arith.constant 0 : index
    %c0_6 = arith.constant 0 : index
    %6 = vector.load %arg4[%c0_5, %c0_6] : memref<8x128xf32, #tpu.memory_space<vmem>>, vector<8x128xf32>
    tpu.vector_store %arg4[%c0_5, %c0_6], %5 {strides = array<i32>} : memref<8x128xf32, #tpu.memory_space<vmem>>, vector<8x128xf32>,
    return
  }
  func.func @transform_0(%arg0: i32) -> (i32, i32) {
    %c0_i32 = arith.constant 0 : i32
    %c0_i32_0 = arith.constant 0 : i32
    return %arg0, %c0_i32 : i32, i32
  }
  func.func @transform_1(%arg0: i32) -> (i32, i32) {
    %c0_i32 = arith.constant 0 : i32
    %c0_i32_0 = arith.constant 0 : i32
    %c0_i32_1 = arith.constant 0 : i32
    return %c0_i32, %c0_i32_0 : i32, i32
  }
  func.func @transform_2(%arg0: i32) -> (i32, i32) {
    %c0_i32 = arith.constant 0 : i32
    %c0_i32_0 = arith.constant 0 : i32
    %c0_i32_1 = arith.constant 0 : i32
    return %c0_i32, %c0_i32_0 : i32, i32
  }
  func.func @transform_3(%arg0: i32) -> (i32, i32) {
    %c0_i32 = arith.constant 0 : i32
    %c0_i32_0 = arith.constant 0 : i32
    return %arg0, %c0_i32 : i32, i32
  }
}

</mosaic_0001>

<bundles_post_ra>
// kernel: linear_pallas.1
= control target key start
LH: loop header
LB: loop body
LE: loop exit
PB: predicated region body
PF: predicated region fallthrough
CT: control target
= control target key end

     0   :  { %8 = vsyncpa [#allocation3], 0  ;;  %s880_s0 = inlined_call_operand.hbm [shape: f32[8,32], index: 0, kind: input, shape index: {}]   ;;  %s881_s1 = inlined_call_operand.hbm [shape: f32[32,128], index: 1, kind: input, shape index: {}]   ;;  %s882_s2 = inlined_call_operand.vmem [shape: f32[1,128], index: 2, kind: input, shape index: {}]   ;;  %s883_s3 = inlined_call_operand.hbm [shape: f32[8,128], index: 3, kind: output, shape index: {}]  }
   0x1   :  { %9 = vsyncpa [#allocation6], 0 }
   0x2   :  { %10 = vsyncpa [#allocation4], 0  ;;  %s782_s12 = smov [#allocation2]   ;;  %s783_s14 = smov [#allocation5]  }
   0x3   :  { %s17_s13 = sshll.u32 %s782_s12, 4  ;;  %s26_s15 = sshll.u32 %s783_s14, 4  ;;  %s18_s13 = int_to_ptr.vmem [resolvable:$true] %s17_s13  ;;  %s810_s15 = int_to_ptr.vmem [resolvable:$true] %s26_s15 }
   0x4   :  { %s710_s18 = scalar_lea.hbm %s880_s0, 128 }
   0x5   :  { %p711_p0 = scmp.ne.s32.totalorder %s880_s0, %s710_s18  ;;  %p714_p1 = scmp.lt.u32.totalorder %s710_s18, %s880_s0 }
   0x7   :  { %p716_p2 = pnand %p714_p1, %p711_p0 }
   0x9   :  { %719 = shalt.err (!%p716_p2)
}
   0xa   :  { %s720_s23 = scalar_lea.vmem %s18_s13, 128  ;;  %p725_p4 = scmp.lt.s32.totalorder %s18_s13, %s18_s13 }
   0xb   :  { %p721_p3 = scmp.ne.s32.totalorder %s18_s13, %s720_s23  ;;  %p726_p5 = scmp.lt.s32.totalorder %s720_s23, %s720_s23 }
   0xd   :  { %p727_p6 = por %p726_p5, %p725_p4 }
   0xf   :  { %p728_p7 = pnand %p727_p6, %p721_p3 }
  0x11   :  { %731 = shalt.err (!%p728_p7)
}
  0x12   :  { %20 = dma.hbm_to_vmem [thread:$0]  %s880_s0, 128, %s18_s13, [#allocation3]  }
  0x13   :  { %s732_s28 = scalar_lea.hbm %s881_s1, 512 }
  0x14   :  { %p733_p8 = scmp.ne.s32.totalorder %s881_s1, %s732_s28  ;;  %p736_p9 = scmp.lt.u32.totalorder %s732_s28, %s881_s1 }
  0x16   :  { %p738_p10 = pnand %p736_p9, %p733_p8 }
  0x18   :  { %741 = shalt.err (!%p738_p10)
}
  0x19   :  { %s742_s6 = scalar_lea.vmem %s810_s15, 512  ;;  %p747_p12 = scmp.lt.s32.totalorder %s810_s15, %s810_s15 }
  0x1a   :  { %p743_p11 = scmp.ne.s32.totalorder %s810_s15, %s742_s6  ;;  %p748_p13 = scmp.lt.s32.totalorder %s742_s6, %s742_s6 }
  0x1c   :  { %p749_p0 = por %p748_p13, %p747_p12 }
  0x1e   :  { %p750_p1 = pnand %p749_p0, %p743_p11 }
  0x20   :  { %753 = shalt.err (!%p750_p1)
}
  0x21   :  { %s784_s0 = smov 128   ;;  %s785_s7 = smov 8  }
  0x22   :  { %32 = dma.hbm_to_vmem [thread:$0]  %s881_s1, 512, %s810_s15, [#allocation6], %s784_s0, %s784_s0, %s785_s7  }
  0x23   :  { %776 = dma.done.wait [#allocation3], 128  }
  0x24   :  { %777 = vsyncadd [#allocation3], 4294967168 }
  0x25   :  { %778 = dma.done.wait [#allocation6], 512  }
  0x26   :  { %779 = vsyncadd [#allocation6], 4294966784  ;;  %v786_v0 = vmov 0.0|0.0   ;;  %vm787_vm0 = vmmov 0   ;;  %v788_v1 = vmov 0.0   ;;  %vm53_vm1 = vcmask 261120  }
  0x27   :  { %656 = vmatprep.subr.bf16.mxu1 %v786_v0  ;;  %674 = vmatprep.subr.bf16.mxu0 %v786_v0  ;;  %v42_v2 = vld [vmem:[#allocation5] sm:$0xff]  ;;  %v43_v3 = vld [vmem:[#allocation5 + $0x8] sm:$0xff]  ;;  %v44_v4 = vld [vmem:[#allocation5 + $0x10] sm:$0xff]  ;;  %s789_s11 = smov [#allocation7]  }
  0x28   :  { %598 = vmatprep.mubr.msk.f32.mxu1 %vm787_vm0, %v788_v1  ;;  %631 = vmatprep.mubr.msk.f32.mxu0 %vm787_vm0, %v788_v1  ;;  %v58_v5 = vand.u32 4294901760, %v42_v2  ;;  %v61_v6 = vand.u32 4294901760, %v43_v3  ;;  %v45_v7 = vld [vmem:[#allocation5 + $0x18] sm:$0xff]  ;;  %v64_v8 = vand.u32 4294901760, %v44_v4  ;;  %s549_s12 = sshll.u32 %s789_s11, 4  ;;  %s550_s12 = int_to_ptr.vmem [resolvable:$true] %s549_s12 }
  0x29   :  { %v41_v9 = vld [vmem:[#allocation2] sm:$0xff]  ;;  %v67_v10 = vand.u32 4294901760, %v45_v7  ;;  %s754_s13 = scalar_lea.vmem %s550_s12, 128  ;;  %p759_p3 = scmp.lt.s32.totalorder %s550_s12, %s550_s12 }
  0x2a   :  { %v55_v11 = vsel %vm53_vm1, %v41_v9, 0  ;;  %v657_v12 = vpack.c.bf16 %v61_v6, %v58_v5  ;;  %v138_v13 = vsub.f32 %v42_v2, %v58_v5  ;;  %v145_v14 = vsub.f32 %v43_v3, %v61_v6  ;;  %v559_v41 = vld [vmem:[%s882_s2] ss:$0 sm:$0xff]  ;;  %p755_p2 = scmp.ne.s32.totalorder %s550_s12, %s754_s13  ;;  %p760_p4 = scmp.lt.s32.totalorder %s754_s13, %s754_s13 }
  0x2b   :  { %v152_v15 = vsub.f32 %v44_v4, %v64_v8  ;;  %v159_v16 = vsub.f32 %v45_v7, %v67_v10  ;;  %v126_v17 = vand.u32 4294901760, %v55_v11  ;;  %v660_v18 = vpack.c.bf16 %v67_v10, %v64_v8 }
  0x2c   :  { %658 = vmatpush3.bf16.msra.mxu1 %v657_v12  ;;  %676 = vmatpush3.bf16.msra.mxu0 %v657_v12  ;;  %v139_v19 = vand.u32 4294901760, %v138_v13  ;;  %v146_v20 = vand.u32 4294901760, %v145_v14  ;;  %v669_v39 = vpack.c.bf16 %v145_v14, %v138_v13  ;;  %p761_p5 = por %p760_p4, %p759_p3 }
  0x2d   :  { %v153_v21 = vand.u32 4294901760, %v152_v15  ;;  %659 = vmatprep.subr.bf16.mxu1 %v786_v0  ;;  %677 = vmatprep.subr.bf16.mxu0 %v786_v0  ;;  %v127_v22 = vsub.f32 %v55_v11, %v126_v17  ;;  %v160_v23 = vand.u32 4294901760, %v159_v16  ;;  %v672_v40 = vpack.c.bf16 %v159_v16, %v152_v15 }
  0x2e   :  { %v140_v24 = vsub.f32 %v138_v13, %v139_v19  ;;  %v147_v25 = vsub.f32 %v145_v14, %v146_v20  ;;  %v681_v31 = vpack.c.bf16 %v146_v20, %v139_v19  ;;  %p762_p6 = pnand %p761_p5, %p755_p2 }
  0x2f   :  { %v154_v26 = vsub.f32 %v152_v15, %v153_v21  ;;  %v128_v27 = vand.u32 4294901760, %v127_v22  ;;  %v161_v28 = vsub.f32 %v159_v16, %v160_v23  ;;  %v684_v37 = vpack.c.bf16 %v160_v23, %v153_v21 }
  0x30   :  { %661 = vmatpush3.bf16.msra.mxu1 %v660_v18  ;;  %679 = vmatpush3.bf16.msra.mxu0 %v660_v18  ;;  %v141_v29 = vand.u32 4294901760, %v140_v24  ;;  %v148_v30 = vand.u32 4294901760, %v147_v25 }
  0x31   :  { %v129_v32 = vsub.f32 %v127_v22, %v128_v27  ;;  %662 = vmatprep.subr.bf16.mxu1 %v786_v0  ;;  %680 = vmatprep.subr.bf16.mxu0 %v786_v0  ;;  %v155_v34 = vand.u32 4294901760, %v154_v26  ;;  %v162_v35 = vand.u32 4294901760, %v161_v28 }
  0x32   :  { %v663_v33 = vpack.c.bf16 %v148_v30, %v141_v29 }
  0x33   :  { %v130_v36 = vand.u32 4294901760, %v129_v32  ;;  %632 = vmatmul.mubr.f32.vlgmr.msra.gmra.mrb[0].mxu0 %v128_v27  ;;  %v666_v38 = vpack.c.bf16 %v162_v35, %v155_v34 }
  0x34   :  { %682 = vmatpush3.bf16.msra.mxu0 %v681_v31  ;;  %642 = vmatprep.mubr.msk.f32.mxu0 %vm787_vm0, %v788_v1 }
  0x35   :  { %599 = vmatmul.mubr.f32.vlgmr.msra.gmra.mrb[0].mxu1 %v130_v36  ;;  %683 = vmatprep.subr.bf16.mxu0 %v786_v0 }
  0x36   :  { %664 = vmatpush3.bf16.msra.mxu1 %v663_v33  ;;  %609 = vmatprep.mubr.msk.f32.mxu1 %vm787_vm0, %v788_v1 }
  0x37   :  { %665 = vmatprep.subr.bf16.mxu1 %v786_v0 }
  0x38   :  { %685 = vmatpush3.bf16.msra.mxu0 %v684_v37 }
  0x39   :  { %686 = vmatprep.subr.bf16.mxu0 %v786_v0 }
  0x3a   :  { %667 = vmatpush3.bf16.msra.mxu1 %v666_v38 }
  0x3b   :  { %668 = vmatprep.subr.bf16.mxu1 %v786_v0  ;;  %643 = vmatmul.mubr.f32.vlgmr.msra.gmra.mrb[0].mxu0 %v126_v17 }
  0x3c   :  { %688 = vmatpush3.bf16.msra.mxu0 %v657_v12  ;;  %653 = vmatprep.mubr.msk.f32.mxu0 %vm787_vm0, %v788_v1 }
  0x3d   :  { %610 = vmatmul.mubr.f32.vlgmr.msra.gmra.mrb[0].mxu1 %v126_v17  ;;  %689 = vmatprep.subr.bf16.mxu0 %v786_v0 }
  0x3e   :  { %670 = vmatpush3.bf16.msra.mxu1 %v669_v39  ;;  %620 = vmatprep.mubr.msk.f32.mxu1 %vm787_vm0, %v788_v1 }
  0x3f   :  { %671 = vmatprep.subr.bf16.mxu1 %v786_v0 }
  0x40   :  { %691 = vmatpush3.bf16.msra.mxu0 %v660_v18 }
  0x42   :  { %673 = vmatpush3.bf16.msra.mxu1 %v672_v40 }
  0x43   :  { %654 = vmatmul.mubr.f32.vlgmr.msra.gmra.mrb[0].mxu0 %v126_v17 }
  0x45   :  { %621 = vmatmul.mubr.f32.vlgmr.msra.gmra.mrb[0].mxu1 %v127_v22 }
 0x116   :  { %v538_v42 = vpop.f32.mrb[0].mxu0 }
 0x117   :  { %v655_v43 = vpop.f32.mrb[1].mxu0 }
 0x118   :  { %v303_v44 = vpop.f32.mrb[0].mxu1 }
 0x119   :  { %v692_v45 = vadd.f32 %v559_v41, %v303_v44  ;;  %v622_v46 = vpop.f32.mrb[1].mxu1 }
 0x11b   :  { %v693_v47 = vadd.f32 %v692_v45, %v538_v42 }
 0x11d   :  { %542 = vst [vmem:[#allocation7] sm:$0xff] %v693_v47 }
 0x11e   :  { %765 = shalt.err (!%p762_p6)
}
 0x11f   :  { %s766_s2 = scalar_lea.hbm %s883_s3, 128 }
 0x120   :  { %p767_p7 = scmp.ne.s32.totalorder %s883_s3, %s766_s2  ;;  %p770_p8 = scmp.lt.u32.totalorder %s766_s2, %s883_s3 }
 0x122   :  { %p772_p9 = pnand %p770_p8, %p767_p7 }
 0x124   :  { %775 = shalt.err (!%p772_p9)
}
 0x125   :  { %552 = dma.vmem_to_hbm [thread:$0]  %s550_s12, 128, %s883_s3, [#allocation4]  }
 0x126   :  { %780 = dma.done.wait [#allocation4], 128  }
 0x127   :  { %781 = vsyncadd [#allocation4], 4294967168 }
 0x128   :  { %556 = vsyncpa [#allocation3], 1 }
 0x129   :  { %557 = vsyncpa [#allocation6], 1 }
 0x12a   :  { %558 = vsyncpa [#allocation4], 1 }

</bundles_post_ra>
